<compile_context>
chip_gen: v7x
topology: tpu7x:2x2x1
jax: 0.10.0
libtpu: 0.0.40
codegen_flags: <defaults>
</compile_context>

<pallas_src>
import functools

import jax
import jax.numpy as jnp
import numpy as np
from jax.experimental import pallas as pl
from jax.experimental.pallas import tpu as pltpu


def _round_up(x, m):
    return ((x + m - 1) // m) * m


def _vmem_budget_bytes():
    """Per-generation VMEM budget (capacity minus headroom for compiler scratch)."""
    cap = 64 * 1024 * 1024  # safe default = v7x per-core VMEM
    try:
        info = pltpu.get_tpu_info()
        cap = int(getattr(info, "vmem_capacity_bytes", cap))
    except Exception:
        pass
    return max(cap - (16 << 20), 32 << 20)


def _select_row_tile(N, fmax, a_itemsize, budget):
    """Pick the node-row tile tm (multiple of 16 for bf16 sublane packing) and
    the padded node count Np from the VMEM budget of the aggregation kernel."""
    tm, Np = 16, _round_up(N, 16)
    for cand in (512, 384, 256, 192, 128, 96, 64, 48, 32, 16):
        if cand > _round_up(N, 16) and cand != 16:
            continue  # don't pad tiny graphs up to a huge tile
        cNp = _round_up(N, cand)
        need = (2 * cand * cNp * a_itemsize   # A row slab, double buffered
                + 2 * cNp * fmax * 2          # HW_r (bf16), double buffered
                + 2 * cand * fmax * 4         # S row tile
                + 2 * cand * fmax * 4         # resident output tile + copy
                + (4 << 20))                  # slack for compiler scratch
        if need <= budget:
            tm, Np = cand, cNp
            break
    # Megacore: make sure the parallel row axis has >= 2 iterations so the
    # second TensorCore (v7x) is not idle for small graphs.
    if Np // tm < 2 and tm > 16:
        tm = max(16, (tm // 2) // 16 * 16)
        Np = _round_up(N, tm)
    return tm, Np


# ---------------------------------------------------------------------------
# Kernels
# ---------------------------------------------------------------------------

def _rgcn_project_kernel(h_ref, w_ref, ws_ref, b_ref, hw_ref, s_ref):
    """Grid = (row_tiles, relations).  HW_r = H_rows @ W_r (bf16 out);
    at r == 0 also S = H_rows @ W_self + b (f32, bias folded in once)."""
    r = pl.program_id(1)
    hw = jnp.dot(h_ref[...], w_ref[...], preferred_element_type=jnp.float32)
    hw_ref[0] = hw.astype(hw_ref.dtype)

    @pl.when(r == 0)
    def _self_loop():
        s_ref[...] = (jnp.dot(h_ref[...], ws_ref[...],
                              preferred_element_type=jnp.float32)
                      + b_ref[...])


def _rgcn_aggregate_kernel(a_ref, hw_ref, s_ref, o_ref, *, activation):
    """Grid = (row_tiles, relations).  o_ref is the resident f32 accumulator.
    A and HW are bf16 -> native bf16 x bf16 MXU matmul, f32 accumulation."""
    r = pl.program_id(1)
    msg = jnp.dot(a_ref[...], hw_ref[...], preferred_element_type=jnp.float32)

    @pl.when(r == 0)
    def _init():
        # Self-loop + bias (precomputed slab) initialises the accumulator.
        o_ref[...] = msg + s_ref[...]

    @pl.when(r > 0)
    def _accumulate():
        o_ref[...] += msg

    @pl.when(r == pl.num_programs(1) - 1)
    def _finalize():
        x = o_ref[...]
        if activation == "relu":
            x = jnp.maximum(x, 0.0)
        elif activation == "tanh":
            x = jnp.tanh(x)
        elif activation == "sigmoid":
            x = jax.nn.sigmoid(x)
        o_ref[...] = x


# ---------------------------------------------------------------------------
# One padded RGCN layer = projection kernel + streaming aggregation kernel
# ---------------------------------------------------------------------------

def rgcn_layer(A, h_bf16, W, W_self, b, activation, *, tm, vmem_limit):
    """A: [R, Np, Np] bf16, h_bf16: [Np, Fin] bf16, W: [R, Fin, Fout] bf16,
    W_self: [Fin, Fout] bf16, b: [1, Fout] f32.  Np % tm == 0, tm % 16 == 0,
    Fin / Fout multiples of 128 (lane-dense stores)."""
    R, Np, _ = A.shape
    Fin = h_bf16.shape[1]
    Fout = W.shape[2]
    assert Np % tm == 0 and tm % 8 == 0, (Np, tm)

    compiler_params = pltpu.CompilerParams(
        dimension_semantics=("parallel", "arbitrary"),
        vmem_limit_bytes=int(vmem_limit),
    )

    # 1) Per-layer projections, computed once (not once per output row tile).
    hw, s = pl.pallas_call(
        _rgcn_project_kernel,
        out_shape=(jax.ShapeDtypeStruct((R, Np, Fout), jnp.bfloat16),
                   jax.ShapeDtypeStruct((Np, Fout), jnp.float32)),
        grid_spec=pltpu.PrefetchScalarGridSpec(
            num_scalar_prefetch=0,
            grid=(Np // tm, R),
            in_specs=[
                pl.BlockSpec((tm, Fin), lambda i, r: (i, 0)),                      # H rows
                pl.BlockSpec((pl.Squeezed(), Fin, Fout), lambda i, r: (r, 0, 0)),  # W_r
                pl.BlockSpec((Fin, Fout), lambda i, r: (0, 0)),                    # W_self
                pl.BlockSpec((1, Fout), lambda i, r: (0, 0)),                      # bias
            ],
            out_specs=(
                pl.BlockSpec((1, tm, Fout), lambda i, r: (r, i, 0)),               # HW
                pl.BlockSpec((tm, Fout), lambda i, r: (i, 0)),                     # S
            ),
        ),
        compiler_params=compiler_params,
    )(h_bf16, W, W_self, b)

    # 2) Stream bf16 A row slabs, accumulate over relations into the resident
    #    output tile, apply activation in the finalize step.
    kernel = functools.partial(_rgcn_aggregate_kernel, activation=activation)
    return pl.pallas_call(
        kernel,
        out_shape=jax.ShapeDtypeStruct((Np, Fout), jnp.float32),
        grid_spec=pltpu.PrefetchScalarGridSpec(
            num_scalar_prefetch=0,
            grid=(Np // tm, R),  # (row tiles: parallel, relations: reduction)
            in_specs=[
                pl.BlockSpec((pl.Squeezed(), tm, Np), lambda i, r: (r, i, 0)),    # A_r rows
                pl.BlockSpec((pl.Squeezed(), Np, Fout), lambda i, r: (r, 0, 0)),  # HW_r
                pl.BlockSpec((tm, Fout), lambda i, r: (i, 0)),                    # S rows
            ],
            out_specs=pl.BlockSpec((tm, Fout), lambda i, r: (i, 0)),
        ),
        compiler_params=compiler_params,
    )(A, hw, s)


# ---------------------------------------------------------------------------
# SELECT_GNN (rgcn) wrapper
# ---------------------------------------------------------------------------

class SelectGNNPallas:
    """SELECT_GNN with gnn_type='rgcn', activation='relu', final_activation='tanh'."""

    def __init__(self, num_features, n_classes, num_hidden, gnn_layers,
                 num_rels, grid_nodes, key):
        self.grid_nodes = grid_nodes
        self.activation = "relu"
        self.final_activation = "tanh"
        self.n_classes = n_classes
        dims = [num_features] + [num_hidden] * (gnn_layers - 1) + [n_classes]
        self.params = []
        for l in range(gnn_layers):
            fin, fout = dims[l], dims[l + 1]
            key, k1, k2, k3 = jax.random.split(key, 4)
            scale = 1.0 / np.sqrt(fin)
            W = jax.random.normal(k1, (num_rels, fin, fout), jnp.float32) * scale
            W_self = jax.random.normal(k2, (fin, fout), jnp.float32) * scale
            b = jax.random.normal(k3, (1, fout), jnp.float32) * 0.1
            self.params.append((W, W_self, b))

    def forward(self, data, A, graph_sizes):
        N = data.shape[0]
        R = A.shape[0]

        # Padded feature dims (lane-dense multiples of 128) across all layers.
        feat_dims = [self.params[0][0].shape[1]] + [p[0].shape[2] for p in self.params]
        fmax = max(_round_up(d, 128) for d in feat_dims)

        budget = _vmem_budget_bytes()
        tm, Np = _select_row_tile(N, fmax, jnp.dtype(jnp.bfloat16).itemsize, budget)

        # Adjacency streamed in bf16 (halves the dominant HBM stream; the
        # reference applies the identical cast).
        A_p = jnp.zeros((R, Np, Np), jnp.bfloat16).at[:, :N, :N].set(
            A.astype(jnp.bfloat16))

        fin0 = data.shape[1]
        fin_p = _round_up(fin0, 128)
        h = jnp.zeros((Np, fin_p), jnp.float32).at[:N, :fin0].set(data)

        n_layers = len(self.params)
        for l, (W, W_self, b) in enumerate(self.params):
            fin, fout = W.shape[1], W.shape[2]
            fout_p = _round_up(fout, 128)
            W_p = jnp.zeros((R, fin_p, fout_p), jnp.bfloat16
                            ).at[:, :fin, :fout].set(W.astype(jnp.bfloat16))
            Ws_p = jnp.zeros((fin_p, fout_p), jnp.bfloat16
                             ).at[:fin, :fout].set(W_self.astype(jnp.bfloat16))
            b_p = jnp.zeros((1, fout_p), jnp.float32).at[:, :fout].set(b)
            act = self.activation if l < n_layers - 1 else self.final_activation
            h = rgcn_layer(A_p, h.astype(jnp.bfloat16), W_p, Ws_p, b_p, act,
                           tm=tm, vmem_limit=budget)
            fin_p = fout_p

        # Un-pad; torch.squeeze(x, 1) is a no-op when n_classes > 1.
        logits = h[:N, :self.n_classes]
        # Robot node index per batched graph: running node offset + grid_nodes.
        offsets = np.concatenate([[0], np.cumsum(graph_sizes)[:-1]])
        indexes = jnp.asarray(offsets + self.grid_nodes, dtype=jnp.int32)
        return jnp.take(logits, indexes, axis=0)


# ---------------------------------------------------------------------------
# Pure-JAX reference of the same (bf16-internal) math
# ---------------------------------------------------------------------------

def _reference(model, data, A):
    A32 = A.astype(jnp.bfloat16).astype(jnp.float32)
    h = data
    n_layers = len(model.params)
    for l, (W, W_self, b) in enumerate(model.params):
        hb = h.astype(jnp.bfloat16).astype(jnp.float32)
        Wb = W.astype(jnp.bfloat16).astype(jnp.float32)
        Wsb = W_self.astype(jnp.bfloat16).astype(jnp.float32)
        hw = jnp.einsum("nk,rkf->rnf", hb, Wb)
        hw = hw.astype(jnp.bfloat16).astype(jnp.float32)
        acc = hb @ Wsb + b
        for r in range(A.shape[0]):
            acc = acc + A32[r] @ hw[r]
        h = jnp.maximum(acc, 0.0) if l < n_layers - 1 else jnp.tanh(acc)
    return h


if __name__ == "__main__":
    key = jax.random.PRNGKey(0)

    # Two graphs of 16 nodes each, batched into one big graph of N=32 nodes.
    graph_sizes = [16, 16]
    N = sum(graph_sizes)
    num_features = 8
    num_hidden = 16
    n_classes = 4
    num_rels = 3
    gnn_layers = 2
    grid_nodes = 0

    key, kx, ka, kp = jax.random.split(key, 4)
    data = jax.random.normal(kx, (N, num_features), jnp.float32)

    # Dense per-relation adjacency, block-diagonal over the graphs, row-normalized.
    raw = (jax.random.uniform(ka, (num_rels, N, N)) < 0.25).astype(jnp.float32)
    block_mask = np.zeros((N, N), np.float32)
    off = 0
    for s in graph_sizes:
        block_mask[off:off + s, off:off + s] = 1.0
        off += s
    raw = raw * jnp.asarray(block_mask)
    deg = jnp.maximum(raw.sum(axis=-1, keepdims=True), 1.0)
    A = raw / deg

    model = SelectGNNPallas(num_features, n_classes, num_hidden, gnn_layers,
                            num_rels, grid_nodes, kp)

    out = model.forward(data, A, graph_sizes)
    out = jax.block_until_ready(out)

    # Correctness check against a pure-JAX reference of the same math.
    # Tolerance is bf16-level because the kernel's internal data path (A, W,
    # inter-layer H, HW) is bf16 with f32 accumulation.
    ref_full = _reference(model, data, A)
    offsets = np.concatenate([[0], np.cumsum(graph_sizes)[:-1]]) + grid_nodes
    ref = ref_full[jnp.asarray(offsets, jnp.int32)]
    np.testing.assert_allclose(np.asarray(out), np.asarray(ref),
                               rtol=1e-2, atol=1e-2)

    assert out.shape == (len(graph_sizes), n_classes)
    print("KERNEL_OK")
</pallas_src>

<mosaic_0001>
module attributes {stable_mosaic.version = 11 : i64} {
  func.func @_rgcn_project_kernel(%arg0: i32, %arg1: i32, %arg2: memref<16x128xbf16, #tpu.memory_space<vmem>>, %arg3: memref<1x128x128xbf16, #tpu.memory_space<vmem>>, %arg4: memref<128x128xbf16, #tpu.memory_space<vmem>>, %arg5: memref<1x128xf32, #tpu.memory_space<vmem>>, %arg6: memref<1x16x128xbf16, #tpu.memory_space<vmem>>, %arg7: memref<16x128xf32, #tpu.memory_space<vmem>>) attributes {dimension_semantics = [#tpu.dimension_semantics<parallel>, #tpu.dimension_semantics<arbitrary>], iteration_bounds = array<i64: 2, 3>, scalar_prefetch = 0 : i64, scratch_operands = 0 : i64, tpu.core_type = #tpu.core_type<tc>, window_params = [{transform_indices = @transform_0, window_bounds = array<i64: 16, 128>}, {transform_indices = @transform_1, window_bounds = array<i64: 1, 128, 128>}, {pipeline_mode = #tpu.pipeline_mode<synchronous>, transform_indices = @transform_2, window_bounds = array<i64: 128, 128>}, {pipeline_mode = #tpu.pipeline_mode<synchronous>, transform_indices = @transform_3, window_bounds = array<i64: 1, 128>}, {transform_indices = @transform_4, window_bounds = array<i64: 1, 16, 128>}, {transform_indices = @transform_5, window_bounds = array<i64: 16, 128>}]} {
    %c0 = arith.constant 0 : index
    %c0_0 = arith.constant 0 : index
    %0 = vector.load %arg2[%c0, %c0_0] : memref<16x128xbf16, #tpu.memory_space<vmem>>, vector<16x128xbf16>
    %c0_1 = arith.constant 0 : index
    %c0_2 = arith.constant 0 : index
    %c0_3 = arith.constant 0 : index
    %1 = vector.load %arg3[%c0_1, %c0_2, %c0_3] : memref<1x128x128xbf16, #tpu.memory_space<vmem>>, vector<1x128x128xbf16>
    %2 = vector.shape_cast %1 : vector<1x128x128xbf16> to vector<128x128xbf16>
    %cst = arith.constant dense<0.000000e+00> : vector<16x128xf32>
    %3 = tpu.matmul %0, %2, %cst {dimension_numbers = #tpu.dot_dimension_numbers<[1], [0], [0], [1], [0, 0, 1, 1], [], []>} : vector<16x128xbf16>, vector<128x128xbf16>, vector<16x128xf32> -> vector<16x128xf32>
    %4 = arith.truncf %3 : vector<16x128xf32> to vector<16x128xbf16>
    %c0_4 = arith.constant 0 : index
    %c0_5 = arith.constant 0 : index
    %c0_6 = arith.constant 0 : index
    %5 = vector.load %arg6[%c0_4, %c0_5, %c0_6] : memref<1x16x128xbf16, #tpu.memory_space<vmem>>, vector<1x16x128xbf16>
    %6 = vector.shape_cast %5 : vector<1x16x128xbf16> to vector<16x128xbf16>
    %7 = vector.shape_cast %4 : vector<16x128xbf16> to vector<1x16x128xbf16>
    tpu.vector_store %arg6[%c0_4, %c0_5, %c0_6], %7 {strides = array<i32>} : memref<1x16x128xbf16, #tpu.memory_space<vmem>>, vector<1x16x128xbf16>,
    %c0_i32 = arith.constant 0 : i32
    %8 = arith.cmpi eq, %arg1, %c0_i32 : i32
    %9 = arith.extui %8 : i1 to i32
    %c0_i32_7 = arith.constant 0 : i32
    %10 = arith.cmpi ne, %9, %c0_i32_7 : i32
    scf.if %10 {
      %c0_8 = arith.constant 0 : index
      %c0_9 = arith.constant 0 : index
      %11 = vector.load %arg2[%c0_8, %c0_9] : memref<16x128xbf16, #tpu.memory_space<vmem>>, vector<16x128xbf16>
      %c0_10 = arith.constant 0 : index
      %c0_11 = arith.constant 0 : index
      %12 = vector.load %arg4[%c0_10, %c0_11] : memref<128x128xbf16, #tpu.memory_space<vmem>>, vector<128x128xbf16>
      %cst_12 = arith.constant dense<0.000000e+00> : vector<16x128xf32>
      %13 = tpu.matmul %11, %12, %cst_12 {dimension_numbers = #tpu.dot_dimension_numbers<[1], [0], [0], [1], [0, 0, 1, 1], [], []>} : vector<16x128xbf16>, vector<128x128xbf16>, vector<16x128xf32> -> vector<16x128xf32>
      %c0_13 = arith.constant 0 : index
      %c0_14 = arith.constant 0 : index
      %14 = vector.load %arg5[%c0_13, %c0_14] : memref<1x128xf32, #tpu.memory_space<vmem>>, vector<1x128xf32>
      %15 = vector.broadcast %14 : vector<1x128xf32> to vector<16x128xf32>
      %16 = arith.addf %13, %15 : vector<16x128xf32>
      %c0_15 = arith.constant 0 : index
      %c0_16 = arith.constant 0 : index
      %17 = vector.load %arg7[%c0_15, %c0_16] : memref<16x128xf32, #tpu.memory_space<vmem>>, vector<16x128xf32>
      tpu.vector_store %arg7[%c0_15, %c0_16], %16 {strides = array<i32>} : memref<16x128xf32, #tpu.memory_space<vmem>>, vector<16x128xf32>,
    } else {
    }
    return
  }
  func.func @transform_0(%arg0: i32, %arg1: i32) -> (i32, i32) {
    %c0_i32 = arith.constant 0 : i32
    %c0_i32_0 = arith.constant 0 : i32
    return %arg0, %c0_i32 : i32, i32
  }
  func.func @transform_1(%arg0: i32, %arg1: i32) -> (i32, i32, i32) {
    %c0_i32 = arith.constant 0 : i32
    %c0_i32_0 = arith.constant 0 : i32
    %c0_i32_1 = arith.constant 0 : i32
    return %arg1, %c0_i32, %c0_i32_0 : i32, i32, i32
  }
  func.func @transform_2(%arg0: i32, %arg1: i32) -> (i32, i32) {
    %c0_i32 = arith.constant 0 : i32
    %c0_i32_0 = arith.constant 0 : i32
    %c0_i32_1 = arith.constant 0 : i32
    return %c0_i32, %c0_i32_0 : i32, i32
  }
  func.func @transform_3(%arg0: i32, %arg1: i32) -> (i32, i32) {
    %c0_i32 = arith.constant 0 : i32
    %c0_i32_0 = arith.constant 0 : i32
    %c0_i32_1 = arith.constant 0 : i32
    return %c0_i32, %c0_i32_0 : i32, i32
  }
  func.func @transform_4(%arg0: i32, %arg1: i32) -> (i32, i32, i32) {
    %c0_i32 = arith.constant 0 : i32
    %c0_i32_0 = arith.constant 0 : i32
    return %arg1, %arg0, %c0_i32 : i32, i32, i32
  }
  func.func @transform_5(%arg0: i32, %arg1: i32) -> (i32, i32) {
    %c0_i32 = arith.constant 0 : i32
    %c0_i32_0 = arith.constant 0 : i32
    return %arg0, %c0_i32 : i32, i32
  }
}

</mosaic_0001>

<bundles_post_ra>
// kernel: tpu_custom_call.1
= control target key start
LH: loop header
LB: loop body
LE: loop exit
PB: predicated region body
PF: predicated region fallthrough
CT: control target
= control target key end

     0   :  { %s1830_s0 = inlined_call_operand.hbm [shape: bf16[32,128], index: 0, kind: input, shape index: {}]   ;;  %s1831_s1 = inlined_call_operand.hbm [shape: bf16[3,128,128], index: 1, kind: input, shape index: {}]   ;;  %s1832_s2 = inlined_call_operand.hbm [shape: bf16[128,128], index: 2, kind: input, shape index: {}]   ;;  %s1833_s3 = inlined_call_operand.vmem [shape: f32[1,128], index: 3, kind: input, shape index: {}]   ;;  %s1834_s4 = inlined_call_operand.hbm [shape: bf16[3,32,128], index: 4, kind: output, shape index: {0}]   ;;  %s1835_s5 = inlined_call_operand.hbm [shape: f32[32,128], index: 5, kind: output, shape index: {1}]  }
   0x1   :  { %1867 = sst [smem:[#allocation30_spill]] %s1830_s0 }
   0x2   :  { %1868 = sst [smem:[#allocation31_spill]] %s1831_s1 }
   0x3   :  { %1869 = sst [smem:[#allocation32_spill]] %s1832_s2 }
   0x4   :  { %1870 = sst [smem:[#allocation33_spill]] %s1833_s3 }
   0x5   :  { %1871 = sst [smem:[#allocation34_spill]] %s1834_s4 }
   0x6   :  { %1872 = sst [smem:[#allocation35_spill]] %s1835_s5 }
   0x7   :  { %11 = vsyncpa [#allocation3], 0 }
   0x8   :  { %13 = vsyncpa [#allocation3 + $0x1], 0 }
   0x9   :  { %14 = vsyncpa [#allocation6], 0 }
   0xa   :  { %16 = vsyncpa [#allocation6 + $0x1], 0 }
   0xb   :  { %17 = vsyncpa [#allocation4], 0 }
   0xc   :  { %19 = vsyncpa [#allocation4 + $0x1], 0 }
   0xd   :  { %20 = vsyncpa [#allocation10], 0 }
   0xe   :  { %22 = vsyncpa [#allocation10 + $0x1], 0  ;;  %s1375_s18 = smov 0   ;;  %s1377_s19 = smov 0  }
   0xf   :  { %s1379_s20 = smov 0   ;;  %s1381_s21 = smov 0  }
  0x10   :  { %s1383_s22 = smov 0   ;;  %s1385_s23 = smov 0  }
  0x11   :  { %s1387_s24 = smov 0   ;;  %s1389_s25 = smov 0  }
  0x12   :  { %s1391_s26 = smov 0   ;;  %s1393_s27 = smov 0  }
  0x13   :  { %s1395_s28 = smov 0   ;;  %s1397_s29 = smov 0  }
  0x14   :  { %s1399_s30 = smov 0   ;;  %s1401_s6 = smov 0  }
  0x15 LB: > { %1873 = sst [smem:[#allocation16_spill]] %s1276_s18  ;;  %s1444_s7 = sadd.s32 4294967295, %s1328_s6   ;;  %s1328_s6 = sphi %s1401_s6, %s28_s6   ;;  %s1324_s30 = sphi %s1399_s30, %s1949_s30   ;;  %s1320_s29 = sphi %s1397_s29, %s1948_s29   ;;  %s1316_s28 = sphi %s1395_s28, %s1947_s28   ;;  %s1312_s27 = sphi %s1393_s27, %s1946_s27   ;;  %s1308_s26 = sphi %s1391_s26, %s1945_s26   ;;  %s1304_s25 = sphi %s1389_s25, %s1944_s25   ;;  %s1300_s24 = sphi %s1387_s24, %s1943_s24   ;;  %s1296_s23 = sphi %s1385_s23, %s1942_s23   ;;  %s1292_s22 = sphi %s1383_s22, %s1941_s22   ;;  %s1288_s21 = sphi %s1381_s21, %s1940_s21   ;;  %s1284_s20 = sphi %s1379_s20, %s1939_s20   ;;  %s1280_s19 = sphi %s1377_s19, %s1938_s19   ;;  %s1276_s18 = sphi %s1375_s18, %s1934_s18  }
  0x16   : > { %1874 = sst [smem:[#allocation17_spill]] %s1280_s19  ;;  %s764_s8 = sadd.s32 4294967294, %s1328_s6  }
  0x17   : > { %1875 = sst [smem:[#allocation18_spill]] %s1292_s22  ;;  %p60_p0 = scmp.ne.s32.totalorder %s1304_s25, %s1300_s24 }
  0x18   : > { %1876 = sst [smem:[#allocation19_spill]] %s1300_s24  ;;  %p1840_p1 = scmp.eq.s32.totalorder %s1444_s7, 0 }
  0x19   : > { %1877 = sst [smem:[#allocation20_spill]] %s1312_s27  ;;  %p86_p2 = scmp.ne.s32.totalorder %s1292_s22, %s1288_s21 }
  0x1a   : > { %1878 = sst [smem:[#allocation21_spill]] %s1316_s28  ;;  %p153_p3 = scmp.ne.s32.totalorder %s1284_s20, %s1280_s19 }
  0x1b   : > { %1879 = sst [smem:[#allocation22_spill]] %s1444_s7  ;;  %p1458_p4 = por %p1840_p1, %p60_p0 }
  0x1c   : > { %p1842_p5 = scmp.eq.s32.totalorder %s1444_s7, 5  ;;  %p1465_p6 = por %p86_p2, %p1840_p1 }
  0x1d   : > { %s1880_s9 = scalar_select %p1458_p4, 1, 0 }
  0x1e   : > { %s1881_s10 = scalar_select %p1465_p6, 1, 0 }
  0x1f   : > { %p159_p7 = scmp.ne.s32.totalorder %s1280_s19, %s1276_s18  ;;  %p1473_p8 = por %p1842_p5, %p153_p3 }
  0x20   : > { %1882 = sst [smem:[#allocation23_spill]] %s1881_s10  ;;  %p160_p9 = scmp.eq.s32.totalorder %s764_s8, 5 }
  0x21   : > { %s1883_s11 = scalar_select %p1473_p8, 1, 0 }
  0x22   : > { %p765_p10 = scmp.ge.s32.totalorder %s1328_s6, 1  ;;  %p193_p11 = scmp.lt.s32.totalorder %s1328_s6, 7 }
  0x23   : > { %1884 = sst [smem:[#allocation24_spill]] %s1883_s11  ;;  %p1479_p12 = por %p160_p9, %p159_p7 }
  0x24   : > { %p1486_p13 = por %p160_p9, %p60_p0  ;;  %p1490_p2 = pnand %p765_p10, %p193_p11 }
  0x25   : > { %s1885_s12 = scalar_select %p1479_p12, 1, 0 }
  0x26   : > { %s1887_s13 = scalar_select %p1486_p13, 1, 0 }
  0x27   : > { %1886 = sst [smem:[#allocation25_spill]] %s1885_s12  ;;  %p891_p3 = pneg %p1490_p2 }
  0x28   : > { %1888 = sst [smem:[#allocation26_spill]] %s1887_s13  ;;  %s1330_s15 = smov [#allocation7]  }
  0x29   : > { %s1889_s14 = scalar_select %p1490_p2, 1, 0 }
  0x2a   : > { %s205_s16 = sshll.u32 %s1330_s15, 4  ;;  %p1498_p7 = pnand %p891_p3, %p1840_p1  ;;  %s206_s16 = int_to_ptr.vmem [resolvable:$true] %s205_s16 }
  0x2b   : > { %s1891_s2 = sld [smem:[#allocation32_spill]] }
  0x2c   : > { %p1056_p9 = pneg %p1498_p7 }
  0x31   : > { %s1054_s13 = scalar_lea.hbm %s1891_s2, 1024 }
  0x32   : > { %p1055_p0 = scmp.ne.s32.totalorder %s1891_s2, %s1054_s13  ;;  %p1061_p3 = scmp.lt.u32.totalorder %s1054_s13, %s1891_s2 }
  0x34   : > { %p1057_p10 = pnand %p1056_p9, %p1055_p0 }
  0x36   : > { %p1058_p11 = pneg %p1057_p10 }
  0x38   : > { %p1063_p1 = pnand %p1061_p3, %p1058_p11 }
  0x3a   : > { %1066 = shalt.err (!%p1063_p1)
}
  0x3b   : > { %s1067_s5 = scalar_lea.vmem %s206_s16, 1024  ;;  %p1075_p8 = scmp.lt.s32.totalorder %s206_s16, %s206_s16 }
  0x3c   : > { %p1068_p5 = scmp.ne.s32.totalorder %s206_s16, %s1067_s5  ;;  %p1076_p6 = scmp.lt.s32.totalorder %s1067_s5, %s1067_s5 }
  0x3e   : > { %p1070_p13 = pnand %p1068_p5, %p1056_p9  ;;  %p1077_p4 = por %p1076_p6, %p1075_p8 }
  0x40   : > { %p1071_p12 = pneg %p1070_p13 }
  0x42   : > { %p1078_p2 = pnand %p1077_p4, %p1071_p12 }
  0x44   : > { %1081 = shalt.err (!%p1078_p2)
}
  0x45   : > { %s1851_s24 = smov 64   ;;  %s1855_s18 = smov 4  }
  0x46   : > { %894 = dma.hbm_to_vmem [thread:$0]  (!%p1498_p7), %s1891_s2, 1024, %s206_s16, [#allocation6], %s1851_s24, %s1851_s24, %s1855_s18  }
  0x47   : > { %p54_p1 = scmp.ne.s32.totalorder %s1308_s26, %s1304_s25  ;;  %p1854_p4 = scmp.eq.s32.totalorder %s1328_s6, 0 }
  0x48   : > { %p1853_p5 = scmp.lt.s32.totalorder %s1328_s6, 6  ;;  %p1892_p6 = scmp.eq.s32.totalorder %s1444_s7, 5 }
  0x49   : > { %s222_s8 = sand.u32 1, %s1308_s26   ;;  %p56_p12 = por %p1854_p4, %p54_p1 }
  0x4a   : > { %p1528_p8 = por %p1892_p6, %p54_p1  ;;  %s768_s17 = sshll.u32 %s222_s8, 3 }
  0x4b   : > { %s811_s15 = sshll.u32 %s1324_s30, 7  ;;  %s1895_s0 = sld [smem:[#allocation30_spill]] }
  0x4c   : > { %s1893_s21 = scalar_select %p1528_p8, 1, 0 }
  0x4d   : > { %s226_s16 = scalar_lea.vmem [#allocation2], %s768_s17  ;;  %p1543_p13 = pnand %p1853_p5, %p56_p12 }
  0x4e   : > { %1894 = sst [smem:[#allocation27_spill]] %s1893_s21  ;;  %s233_s5 = sshll.u32 %s226_s16, 4  ;;  %s1547_s5 = int_to_ptr.vmem [resolvable:$true] %s233_s5 }
  0x4f   : > { %s1549_s13 = scalar_lea.sflag [#allocation3], %s222_s8  ;;  %p1084_p7 = pneg %p1543_p13 }
  0x51   : > { %s1539_s28 = scalar_lea.hbm %s1895_s0, %s811_s15  ;;  %s1087_s15 = scalar_lea.hbm %s1895_s0, 256 }
  0x52   : > { %s1082_s4 = scalar_lea.hbm %s1539_s28, 128  ;;  %p1088_p10 = scmp.lt.u32.totalorder %s1539_s28, %s1895_s0 }
  0x53   : > { %p1083_p2 = scmp.ne.s32.totalorder %s1539_s28, %s1082_s4  ;;  %p1089_p11 = scmp.lt.u32.totalorder %s1087_s15, %s1082_s4 }
  0x54   : > { %p1091_p1 = scmp.lt.u32.totalorder %s1082_s4, %s1539_s28 }
  0x55   : > { %p1085_p0 = pnand %p1084_p7, %p1083_p2  ;;  %p1090_p3 = por %p1089_p11, %p1088_p10 }
  0x57   : > { %p1086_p9 = pneg %p1085_p0  ;;  %p1092_p6 = por %p1091_p1, %p1090_p3 }
  0x59   : > { %p1093_p12 = pnand %p1092_p6, %p1086_p9 }
  0x5b   : > { %1096 = shalt.err (!%p1093_p12)
}
  0x5c   : > { %s1097_s8 = scalar_lea.vmem %s1547_s5, 128  ;;  %s1333_s11 = smov [#allocation2]  }
  0x5d   : > { %p1098_p2 = scmp.ne.s32.totalorder %s1547_s5, %s1097_s8  ;;  %s1102_s17 = sshll.u32 %s1333_s11, 4  ;;  %s1103_s17 = int_to_ptr.vmem [resolvable:$false] %s1102_s17 }
  0x5e   : > { %s1104_s24 = scalar_lea.vmem %s1103_s17, 256  ;;  %p1105_p4 = scmp.lt.s32.totalorder %s1547_s5, %s1103_s17 }
  0x5f   : > { %p1100_p0 = pnand %p1098_p2, %p1084_p7  ;;  %p1106_p10 = scmp.lt.s32.totalorder %s1104_s24, %s1097_s8 }
  0x61   : > { %p1101_p5 = pneg %p1100_p0  ;;  %p1107_p11 = por %p1106_p10, %p1105_p4 }
  0x63   : > { %p1108_p3 = pnand %p1107_p11, %p1101_p5 }
  0x65   : > { %1111 = shalt.err (!%p1108_p3)
}
  0x66   : > { %s1897_s4 = smov 64   ;;  %s47_s12 = sadd.s32 1, %s1308_s26 }
  0x67   : > { %898 = dma.hbm_to_vmem [thread:$0]  (!%p1543_p13), %s1539_s28, 128, %s1547_s5, %s1549_s13, %s1897_s4, %s1897_s4, %s1855_s18  }
  0x68   : > { %s37_s15 = sadd.s32 1, %s1320_s29  ;;  %s73_s16 = sadd.s32 1, %s1296_s23 }
  0x69   : > { %p38_p4 = scmp.ge.s32.totalorder %s37_s15, 3  ;;  %p80_p5 = scmp.ne.s32.totalorder %s1296_s23, %s1292_s22 }
  0x6a   : > { %s143_s8 = sadd.s32 1, %s1284_s20  ;;  %s1899_s11 = sadd.s32 1, %s1324_s30 }
  0x6b   : > { %s1951_s15 = smov (%p38_p4, %s37_s15), 0  ;;  %s1953_s11 = smov (!%p38_p4, %s1899_s11), %s1324_s30 }
  0x6c   : > { %1898 = sst [smem:[#allocation28_spill]] %s1951_s15  ;;  %s70_s17 = ssub.s32 %s1320_s29, %s1951_s15 }
  0x6d   : > { %s243_s24 = sand.u32 1, %s1328_s6   ;;  %p42_p7 = scmp.ge.s32.totalorder %s1953_s11, 2 }
  0x6e   : > { %p71_p13 = scmp.eq.s32.totalorder %s70_s17, 0  ;;  %p1900_p9 = scmp.eq.s32.totalorder %s1328_s6, 0 }
  0x6f   : > { %s245_s13 = sand.u32 1, %s1296_s23   ;;  %s1955_s11 = smov (%p42_p7, %s1953_s11), 0 }
  0x70   : > { %p1596_p1 = por %p80_p5, %p1900_p9  ;;  %1902 = sst [smem:[#allocation29_spill]] %s1955_s11 }
  0x71   : > { %s1604_s5 = scalar_select %p71_p13, %s1296_s23, %s73_s16  }
  0x72   : > { %s44_s18 = ssub.s32 %s1324_s30, %s1955_s11  ;;  %s771_s0 = sshll.u32 %s245_s13, 6 }
  0x73   : > { %p45_p6 = scmp.eq.s32.totalorder %s44_s18, 0  ;;  %s140_s2 = sor.u32 %s70_s17, %s44_s18 }
  0x74   : > { %p141_p12 = scmp.eq.s32.totalorder %s140_s2, 0  ;;  %s812_s3 = sshll.u32 %s1320_s29, 10 }
  0x75   : > { %s1609_s15 = scalar_select %p45_p6, %s1308_s26, %s47_s12  }
  0x76   : > { %s1612_s21 = scalar_select %p141_p12, %s1284_s20, %s143_s8  }
  0x77   : > { %s247_s27 = scalar_lea.vmem [#allocation5], %s771_s0  ;;  %s1903_s1 = sld [smem:[#allocation31_spill]] }
  0x78   : > { %s254_s19 = sshll.u32 %s247_s27, 4  ;;  %p1904_p2 = scmp.lt.s32.totalorder %s1328_s6, 6  ;;  %s1620_s19 = int_to_ptr.vmem [resolvable:$true] %s254_s19 }
  0x79   : > { %s1630_s0 = scalar_lea.sflag [#allocation6], %s243_s24 }
  0x7a   : > { %p1626_p0 = pnand %p1904_p2, %p1596_p1 }
  0x7c   : > { %p1114_p11 = pneg %p1626_p0 }
  0x7d   : > { %s1618_s7 = scalar_lea.hbm %s1903_s1, %s812_s3  ;;  %s1117_s10 = scalar_lea.hbm %s1903_s1, 3072 }
  0x7e   : > { %s1112_s27 = scalar_lea.hbm %s1618_s7, 1024  ;;  %p1118_p5 = scmp.lt.u32.totalorder %s1618_s7, %s1903_s1 }
  0x7f   : > { %p1113_p10 = scmp.ne.s32.totalorder %s1618_s7, %s1112_s27  ;;  %p1119_p7 = scmp.lt.u32.totalorder %s1117_s10, %s1112_s27 }
  0x80   : > { %p1121_p9 = scmp.lt.u32.totalorder %s1112_s27, %s1618_s7 }
  0x81   : > { %p1115_p3 = pnand %p1114_p11, %p1113_p10  ;;  %p1120_p13 = por %p1119_p7, %p1118_p5 }
  0x83   : > { %p1116_p4 = pneg %p1115_p3  ;;  %p1122_p1 = por %p1121_p9, %p1120_p13 }
  0x85   : > { %p1123_p6 = pnand %p1122_p1, %p1116_p4 }
  0x87   : > { %1126 = shalt.err (!%p1123_p6)
}
  0x88   : > { %s1127_s16 = scalar_lea.vmem %s1620_s19, 1024  ;;  %s1334_s8 = smov [#allocation5]  }
  0x89   : > { %p1128_p12 = scmp.ne.s32.totalorder %s1620_s19, %s1127_s16  ;;  %s1132_s17 = sshll.u32 %s1334_s8, 4  ;;  %s1133_s17 = int_to_ptr.vmem [resolvable:$false] %s1132_s17 }
  0x8a   : > { %s1134_s24 = scalar_lea.vmem %s1133_s17, 2048  ;;  %p1135_p3 = scmp.lt.s32.totalorder %s1620_s19, %s1133_s17 }
  0x8b   : > { %p1130_p2 = pnand %p1128_p12, %p1114_p11  ;;  %p1136_p5 = scmp.lt.s32.totalorder %s1134_s24, %s1127_s16 }
  0x8d   : > { %p1131_p10 = pneg %p1130_p2  ;;  %p1137_p7 = por %p1136_p5, %p1135_p3 }
  0x8f   : > { %p1138_p13 = pnand %p1137_p7, %p1131_p10 }
  0x91   : > { %1141 = shalt.err (!%p1138_p13)
}
  0x92   : > { %s1906_s28 = smov 4   ;;  %p1907_p11 = scmp.ne.s32.totalorder %s1889_s14, 0 }
  0x93   : > { %901 = dma.hbm_to_vmem [thread:$0]  (!%p1626_p0), %s1618_s7, 1024, %s1620_s19, %s1630_s0, %s1897_s4, %s1897_s4, %s1906_s28  }
  0x94   : > { %266 = sbr.rel (%p1907_p11) target bundleno = 690 (0x2b2), region = 36  ;;  %s1664_s13 = sand.u32 (!%p1907_p11), 1, %s1304_s25  }
  0x95   : > { %s775_s27 = sshll.u32 (!%p1907_p11), %s1664_s13, 3  ;;  %s269_s3 = scalar_lea.sflag (!%p1907_p11), [#allocation3], %s1664_s13 }
  0x96   : > { %s1668_s22 = scalar_lea.vmem (!%p1907_p11), [#allocation2], %s775_s27  ;;  %p1908_p4 = scmp.ne.s32.totalorder (!%p1907_p11), %s1880_s9, 0 }
  0x9b   : > { %1255 = dma.done.wait (%p1908_p4), %s269_s3, 128  }
  0x9c   : > { %1257 = vsyncadd (%p1908_p4), %s269_s3, 4294967168  ;;  %s1909_s2 = sld [smem:[#allocation22_spill]]  ;;  %s1910_s19 = sld [smem:[#allocation18_spill]] }
  0x9d   : > { %s1911_s7 = sld [smem:[#allocation23_spill]] }
  0xa2   : > { %s277_s14 = sand.u32 1, %s1909_s2   ;;  %s279_s4 = sand.u32 1, %s1910_s19  }
  0xa3   : > { %s776_s0 = sshll.u32 %s279_s4, 6  ;;  %s278_s10 = scalar_lea.sflag [#allocation6], %s277_s14 }
  0xa4   : > { %s281_s18 = scalar_lea.vmem [#allocation5], %s776_s0  ;;  %p1912_p0 = scmp.ne.s32.totalorder %s1911_s7, 0 }
  0xa6   : > { %1259 = dma.done.wait (%p1912_p0), %s278_s10, 1024  }
  0xa7   : > { %1261 = vsyncadd (%p1912_p0), %s278_s10, 4294966272  ;;  %p1913_p9 = scmp.eq.s32.totalorder %s1909_s2, 0 }
  0xa9   : > { %1263 = dma.done.wait (%p1913_p9), [#allocation6], 1024   ;;  %p1914_p1 = pmov %p1913_p9 }
  0xaa   : > { %s779_s9 = sshll.u32 %s1664_s13, 4  ;;  %v1335_v0 = vmov 0.0   ;;  %vm1336_vm0 = vmmov 0   ;;  %v1036_v1 = vld [vmem:[%s281_s18] sm:$0xff]   ;;  %v1037_v2 = vld [vmem:[%s281_s18 + $0x8] sm:$0xff]   ;;  %v1038_v3 = vld [vmem:[%s281_s18 + $0x10] sm:$0xff]  }
  0xab   : > { %1265 = vsyncadd (%p1914_p1), [#allocation6], 4294966272  ;;  %839 = vmatprep.subr.bf16.mxu0 %v1335_v0  ;;  %855 = vmatprep.mubr.msk.bf16.mxu0 %vm1336_vm0, %v1335_v0  ;;  %v1039_v4 = vld [vmem:[%s281_s18 + $0x18] sm:$0xff]   ;;  %s1915_s12 = sld [smem:[#allocation17_spill]]  ;;  %v1040_v5 = vld [vmem:[%s281_s18 + $0x20] sm:$0xff]   ;;  %s1696_s24 = scalar_lea.vmem [#allocation9], %s779_s9 }
  0xac   : > { %840 = vmatpush3.bf16.msra.mxu0 %v1036_v1  ;;  %v1041_v6 = vld [vmem:[%s281_s18 + $0x28] sm:$0xff]   ;;  %v1042_v7 = vld [vmem:[%s281_s18 + $0x30] sm:$0xff]   ;;  %v1043_v8 = vld [vmem:[%s281_s18 + $0x38] sm:$0xff]   ;;  %s1916_s28 = sld [smem:[#allocation20_spill]] }
  0xad   : > { %841 = vmatprep.subr.bf16.mxu0 %v1335_v0  ;;  %v1044_v9 = vld [vmem:[%s1668_s22] sm:$0xff]  }
  0xb0   : > { %842 = vmatpush3.bf16.msra.mxu0 %v1037_v2 }
  0xb1   : > { %843 = vmatprep.subr.bf16.mxu0 %v1335_v0  ;;  %s312_s16 = sand.u32 1, %s1915_s12  }
  0xb2   : > { %s1689_s8 = sshll.u32 %s312_s16, 3  ;;  %p791_p6 = scmp.ne.s32.totalorder %s1916_s28, 0 }
  0xb3   : > { %s314_s17 = scalar_lea.vmem [#allocation8], %s1689_s8  ;;  %v1045_v15 = vld [vmem:[#allocation7] sm:$0xff] (!%p791_p6)   ;;  %v1337_v16 = vmov (!%p791_p6), 0.0   ;;  %v1046_v17 = vld [vmem:[#allocation7 + $0x8] sm:$0xff] (!%p791_p6)   ;;  %vm1338_vm1 = vmmov (!%p791_p6), 0   ;;  %v1047_v18 = vld [vmem:[#allocation7 + $0x10] sm:$0xff] (!%p791_p6)  }
  0xb4   : > { %844 = vmatpush3.bf16.msra.mxu0 %v1038_v3  ;;  %v1048_v19 = vld [vmem:[#allocation7 + $0x18] sm:$0xff] (!%p791_p6)   ;;  %v1049_v20 = vld [vmem:[#allocation7 + $0x20] sm:$0xff] (!%p791_p6)   ;;  %v1050_v21 = vld [vmem:[#allocation7 + $0x28] sm:$0xff] (!%p791_p6)   ;;  %s1917_s2 = sld [smem:[#allocation33_spill]] (!%p791_p6) }
  0xb5   : > { %845 = vmatprep.subr.bf16.mxu0 %v1335_v0  ;;  %v1051_v22 = vld [vmem:[#allocation7 + $0x30] sm:$0xff] (!%p791_p6)   ;;  %v1052_v23 = vld [vmem:[#allocation7 + $0x38] sm:$0xff] (!%p791_p6)  }
  0xb6   : > { %v1053_v24 = vld [vmem:[%s1668_s22] sm:$0xff] (!%p791_p6)  }
  0xb8   : > { %846 = vmatpush3.bf16.msra.mxu0 %v1039_v4 }
  0xb9   : > { %847 = vmatprep.subr.bf16.mxu0 %v1335_v0 }
  0xba   : > { %v792_v25 = vld [vmem:[%s1917_s2] ss:$0 sm:$0xff] (!%p791_p6) }
  0xbc   : > { %848 = vmatpush3.bf16.msra.mxu0 %v1040_v5 }
  0xbd   : > { %849 = vmatprep.subr.bf16.mxu0 %v1335_v0 }
  0xc0   : > { %850 = vmatpush3.bf16.msra.mxu0 %v1041_v6 }
  0xc1   : > { %851 = vmatprep.subr.bf16.mxu0 %v1335_v0 }
  0xc4   : > { %852 = vmatpush3.bf16.msra.mxu0 %v1042_v7 }
  0xc5   : > { %853 = vmatprep.subr.bf16.mxu0 %v1335_v0 }
  0xc8   : > { %854 = vmatpush3.bf16.msra.mxu0 %v1043_v8 }
  0xc9   : > { %859 = vmatprep.subr.bf16.mxu0 (!%p791_p6), %v1337_v16 }
  0xcb   : > { %856 = vmatmul.mubr.bf16.vlgmr.msra.gmra.mrb[0].mxu0 %v1044_v9 }
  0xcc   : > { %860 = vmatpush3.bf16.msra.mxu0 (!%p791_p6), %v1045_v15  ;;  %875 = vmatprep.mubr.msk.bf16.mxu0 (!%p791_p6), %vm1338_vm1, %v1337_v16 }
  0xcd   : > { %861 = vmatprep.subr.bf16.mxu0 (!%p791_p6), %v1337_v16 }
  0xd0   : > { %862 = vmatpush3.bf16.msra.mxu0 (!%p791_p6), %v1046_v17 }
  0xd1   : > { %863 = vmatprep.subr.bf16.mxu0 (!%p791_p6), %v1337_v16 }
  0xd4   : > { %864 = vmatpush3.bf16.msra.mxu0 (!%p791_p6), %v1047_v18 }
  0xd5   : > { %865 = vmatprep.subr.bf16.mxu0 (!%p791_p6), %v1337_v16 }
  0xd8   : > { %866 = vmatpush3.bf16.msra.mxu0 (!%p791_p6), %v1048_v19 }
  0xd9   : > { %867 = vmatprep.subr.bf16.mxu0 (!%p791_p6), %v1337_v16 }
  0xdc   : > { %868 = vmatpush3.bf16.msra.mxu0 (!%p791_p6), %v1049_v20 }
  0xdd   : > { %869 = vmatprep.subr.bf16.mxu0 (!%p791_p6), %v1337_v16 }
  0xe0   : > { %870 = vmatpush3.bf16.msra.mxu0 (!%p791_p6), %v1050_v21 }
  0xe1   : > { %871 = vmatprep.subr.bf16.mxu0 (!%p791_p6), %v1337_v16 }
  0xe4   : > { %872 = vmatpush3.bf16.msra.mxu0 (!%p791_p6), %v1051_v22 }
  0xe5   : > { %873 = vmatprep.subr.bf16.mxu0 (!%p791_p6), %v1337_v16 }
  0xe8   : > { %874 = vmatpush3.bf16.msra.mxu0 (!%p791_p6), %v1052_v23 }
 0x19d   : > { %452 = sbr.rel (%p791_p6) target bundleno = 634 (0x27a), region = 52 }
 0x19e   : > { %v432_v10 = vpop.f32.mrb[0].mxu0 }
 0x19f   : > { %v857_v11 = vpop.f32.mrb[1].mxu0 }
 0x1a0   : > { %v435_v12 = vpop.f32.mrb[2].mxu0 }
 0x1a1   : > { %v819_v13 = vpack.c.bf16 %v435_v12, %v432_v10  ;;  %v858_v14 = vpop.f32.mrb[3].mxu0  ;;  %876 = vmatmul.mubr.bf16.vlgmr.msra.gmra.mrb[0].mxu0 (!%p791_p6), %v1053_v24 }
 0x1a3   : > { %820 = vst [vmem:[%s314_s17] sm:$0xff] %v819_v13  }
 0x274   : > { %v566_v26 = vpop.f32.mrb[0].mxu0 }
 0x275   : > { %v567_v27 = vadd.f32 %v792_v25, %v566_v26  ;;  %v877_v28 = vpop.f32.mrb[1].mxu0 }
 0x276   : > { %v569_v29 = vpop.f32.mrb[2].mxu0 }
 0x277   : > { %573 = vst [vmem:[%s1696_s24] sm:$0xff] %v567_v27  ;;  %v570_v30 = vadd.f32 %v792_v25, %v569_v29  ;;  %v878_v31 = vpop.f32.mrb[3].mxu0 }
 0x279   : > { %574 = vst [vmem:[%s1696_s24 + $0x8] sm:$0xff] %v570_v30 }
 0x27a PF: > { %s1918_s19 = sld [smem:[#allocation21_spill]]  ;;  %s1919_s7 = sld [smem:[#allocation20_spill]] }
 0x27b   : > { %s1921_s22 = sld [smem:[#allocation24_spill]]  ;;  %s596_s10 = sshll.u32 %s314_s17, 4  ;;  %s1709_s10 = int_to_ptr.vmem [resolvable:$true] %s596_s10 }
 0x27c   : > { %s1922_s27 = sld [smem:[#allocation34_spill]]  ;;  %s1718_s1 = scalar_lea.sflag [#allocation4], %s312_s16 }
 0x27d   : > { %s1142_s11 = scalar_lea.vmem %s1709_s10, 128  ;;  %s1339_s8 = smov [#allocation8]  }
 0x27e   : > { %p1143_p12 = scmp.ne.s32.totalorder %s1709_s10, %s1142_s11  ;;  %s1146_s17 = sshll.u32 %s1339_s8, 4  ;;  %s1147_s17 = int_to_ptr.vmem [resolvable:$false] %s1146_s17 }
 0x27f   : > { %p1149_p5 = scmp.lt.s32.totalorder %s1709_s10, %s1147_s17 }
 0x280   : > { %s804_s4 = sshll.u32 %s1918_s19, 1  ;;  %s805_s0 = sshll.u32 %s1919_s7, 2 }
 0x281   : > { %s593_s18 = sadd.s32 %s805_s0, %s804_s4  ;;  %p1924_p2 = scmp.ne.s32.totalorder %s1921_s22, 0 }
 0x282   : > { %s806_s9 = sshll.u32 %s593_s18, 6  ;;  %s1923_s3 = smov %s1922_s27 }
 0x283   : > { %s1714_s2 = scalar_lea.hbm %s1922_s27, %s806_s9  ;;  %p1144_p10 = pnand %p1143_p12, %p1924_p2 }
 0x284   : > { %s1148_s7 = scalar_lea.vmem %s1147_s17, 256 }
 0x285   : > { %p1145_p3 = pneg %p1144_p10  ;;  %p1150_p7 = scmp.lt.s32.totalorder %s1148_s7, %s1142_s11 }
 0x287   : > { %p1151_p13 = por %p1150_p7, %p1149_p5 }
 0x289   : > { %p1152_p11 = pnand %p1151_p13, %p1145_p3 }
 0x28b   : > { %1155 = shalt.err (!%p1152_p11)
}
 0x28c   : > { %s1156_s16 = scalar_lea.hbm %s1714_s2, 128  ;;  %s1160_s0 = scalar_lea.hbm %s1923_s3, 768 }
 0x28d   : > { %p1157_p4 = scmp.ne.s32.totalorder %s1714_s2, %s1156_s16  ;;  %p1161_p1 = scmp.lt.u32.totalorder %s1714_s2, %s1923_s3 }
 0x28e   : > { %p1162_p6 = scmp.lt.u32.totalorder %s1160_s0, %s1156_s16  ;;  %p1164_p10 = scmp.lt.u32.totalorder %s1156_s16, %s1714_s2 }
 0x28f   : > { %p1158_p0 = pnand %p1157_p4, %p1924_p2 }
 0x290   : > { %p1163_p12 = por %p1162_p6, %p1161_p1 }
 0x291   : > { %p1159_p9 = pneg %p1158_p0 }
 0x292   : > { %p1165_p3 = por %p1164_p10, %p1163_p12 }
 0x294   : > { %p1166_p5 = pnand %p1165_p3, %p1159_p9 }
 0x296   : > { %1169 = shalt.err (!%p1166_p5)
}
 0x297   : > { %s1340_s11 = smov 64   ;;  %s1341_s28 = smov 4  }
 0x298   : > { %887 = dma.vmem_to_hbm [thread:$0]  (%p1924_p2), %s1709_s10, 128, %s1714_s2, %s1718_s1, %s1340_s11, %s1340_s11, %s1341_s28  }
 0x299   : > { %s815_s27 = sshll.u32 %s1918_s19, 8  ;;  %s1926_s7 = sld [smem:[#allocation35_spill]] }
 0x29a   : > { %s612_s14 = sshll.u32 %s1696_s24, 4  ;;  %s581_s4 = scalar_lea.sflag [#allocation10], %s1664_s13  ;;  %s1749_s14 = int_to_ptr.vmem [resolvable:$true] %s612_s14 }
 0x29b   : > { %s1170_s0 = scalar_lea.vmem %s1749_s14, 256  ;;  %s1342_s22 = smov [#allocation9]  }
 0x29c   : > { %p1171_p7 = scmp.ne.s32.totalorder %s1749_s14, %s1170_s0  ;;  %s1174_s1 = sshll.u32 %s1342_s22, 4  ;;  %s1175_s1 = int_to_ptr.vmem [resolvable:$false] %s1174_s1 }
 0x29d   : > { %s1176_s19 = scalar_lea.vmem %s1175_s1, 512  ;;  %p1177_p2 = scmp.lt.s32.totalorder %s1749_s14, %s1175_s1 }
 0x29e   : > { %p1172_p13 = pnand %p1171_p7, %p1528_p8  ;;  %p1178_p4 = scmp.lt.s32.totalorder %s1176_s19, %s1170_s0 }
 0x29f   : > { %s1746_s16 = scalar_lea.hbm %s1926_s7, %s815_s27 }
 0x2a0   : > { %p1173_p11 = pneg %p1172_p13  ;;  %p1179_p0 = por %p1178_p4, %p1177_p2 }
 0x2a2   : > { %p1180_p9 = pnand %p1179_p0, %p1173_p11 }
 0x2a4   : > { %1183 = shalt.err (!%p1180_p9)
}
 0x2a5   : > { %s1184_s24 = scalar_lea.hbm %s1746_s16, 256  ;;  %s1188_s18 = scalar_lea.hbm %s1926_s7, 512 }
 0x2a6   : > { %p1185_p1 = scmp.ne.s32.totalorder %s1746_s16, %s1184_s24  ;;  %p1189_p10 = scmp.lt.u32.totalorder %s1746_s16, %s1926_s7 }
 0x2a7   : > { %p1190_p3 = scmp.lt.u32.totalorder %s1188_s18, %s1184_s24  ;;  %p1192_p7 = scmp.lt.u32.totalorder %s1184_s24, %s1746_s16 }
 0x2a8   : > { %p1186_p6 = pnand %p1185_p1, %p1528_p8 }
 0x2a9   : > { %p1191_p5 = por %p1190_p3, %p1189_p10 }
 0x2aa   : > { %p1187_p12 = pneg %p1186_p6 }
 0x2ab   : > { %p1193_p13 = por %p1192_p7, %p1191_p5 }
 0x2ad   : > { %p1194_p11 = pnand %p1193_p13, %p1187_p12 }
 0x2af   : > { %1197 = shalt.err (!%p1194_p11)
}
 0x2b0   : > { %s1343_s28 = smov 128   ;;  %s1344_s27 = smov 8  }
 0x2b1   : > { %888 = dma.vmem_to_hbm [thread:$0]  (%p1528_p8), %s1749_s14, 256, %s1746_s16, %s581_s4, %s1343_s28, %s1343_s28, %s1344_s27  }
 0x2b2 PF: > { %s1927_s8 = sld [smem:[#allocation16_spill]]  ;;  %s1928_s17 = sld [smem:[#allocation25_spill]] }
 0x2b3   : > { %p912_p2 = scmp.ge.s32.totalorder %s1328_s6, 2 }
 0x2b8   : > { %s627_s0 = sand.u32 1, %s1927_s8   ;;  %p1929_p4 = scmp.ne.s32.totalorder %s1928_s17, 0 }
 0x2b9   : > { %s628_s22 = scalar_lea.sflag [#allocation4], %s627_s0 }
 0x2ba   : > { %p903_p0 = pnand %p912_p2, %p1929_p4 }
 0x2bc   : > { %1267 = dma.done.wait (!%p903_p0), %s628_s22, 128  }
 0x2bd   : > { %1269 = vsyncadd (!%p903_p0), %s628_s22, 4294967168  ;;  %s1930_s1 = sld [smem:[#allocation19_spill]]  ;;  %s1931_s19 = sld [smem:[#allocation26_spill]] }
 0x2c3   : > { %s636_s24 = sand.u32 1, %s1930_s1   ;;  %p1932_p9 = scmp.ne.s32.totalorder %s1931_s19, 0 }
 0x2c4   : > { %s637_s10 = scalar_lea.sflag [#allocation10], %s636_s24 }
 0x2c5   : > { %p906_p1 = pnand %p912_p2, %p1932_p9 }
 0x2c7   : > { %1271 = dma.done.wait (!%p906_p1), %s637_s10, 256  }
 0x2c8   : > { %1273 = vsyncadd (!%p906_p1), %s637_s10, 4294967040  ;;  %s28_s6 = sadd.s32 1, %s1328_s6   ;;  %s1934_s18 = sld [smem:[#allocation17_spill]] }
 0x2c9   : > { %p1783_p8 = scmp.ge.s32.totalorder %s28_s6, 8   ;;  %s1935_s12 = sld [smem:[#allocation18_spill]] }
 0x2ca   : > { %s1936_s16 = sld [smem:[#allocation28_spill]]  ;;  %s1937_s14 = sld [smem:[#allocation29_spill]] }
 0x2cb   : > { %s1938_s19 = smov %s1284_s20  ;;  %s1939_s20 = smov %s1612_s21 }
 0x2cc   : > { %s1941_s22 = smov %s1296_s23  ;;  %s1942_s23 = smov %s1604_s5 }
 0x2cd   : > { %s1943_s24 = smov %s1304_s25  ;;  %s1944_s25 = smov %s1308_s26 }
 0x2ce   : > { %s1945_s26 = smov %s1609_s15  ;;  %s1946_s27 = smov %s1320_s29 }
 0x2cf   : > { %s1940_s21 = smov %s1935_s12  ;;  %s1947_s28 = smov %s1324_s30 }
 0x2d0   : > { %s1948_s29 = smov %s1936_s16  ;;  %s1949_s30 = smov %s1937_s14 }
 0x2d1   :  { %27 = sbr.rel (!%p1783_p8) target bundleno = 21 (0x15), region = 119 }
 0x2d8   :  { %642 = vsyncpa [#allocation3], 1 }
 0x2d9   :  { %644 = vsyncpa [#allocation3 + $0x1], 1 }
 0x2da   :  { %645 = vsyncpa [#allocation6], 1 }
 0x2db   :  { %647 = vsyncpa [#allocation6 + $0x1], 1 }
 0x2dc   :  { %648 = vsyncpa [#allocation4], 1 }
 0x2dd   :  { %650 = vsyncpa [#allocation4 + $0x1], 1 }
 0x2de   :  { %651 = vsyncpa [#allocation10], 1 }
 0x2df   :  { %653 = vsyncpa [#allocation10 + $0x1], 1 }

</bundles_post_ra>
